<compile_context>
chip_gen: v7x
topology: tpu7x:2x2x1
jax: 0.10.0
libtpu: 0.0.40
codegen_flags: <defaults>
</compile_context>

<pallas_src>
import functools

import jax
import jax.numpy as jnp
from jax.experimental import pallas as pl
from jax.experimental.pallas import tpu as pltpu


def _round_up(a, b):
    return ((a + b - 1) // b) * b


def _leaky_relu(v, slope=0.2):
    # slope < 1  =>  leaky_relu(v) == max(v, slope*v): 1 mul + 1 max on the VPU.
    return jnp.maximum(v, slope * v)


def resblock_kernel(x_ref, w1_ref, b1_ref, wd_ref, bd_ref, w2_ref, b2_ref,
                    o_ref, *, compute_dtype):
    # x_ref: (C, T) tile -- channels on sublanes, pixels on the lane axis
    # (lane-dense output stores even for tiny C).
    x = x_ref[...]
    xc = x.astype(compute_dtype)

    # output1 = act(c1(x))
    o1 = jnp.dot(w1_ref[...], xc, preferred_element_type=jnp.float32) + b1_ref[...]
    o1 = _leaky_relu(o1)

    # combine = cat([d1, d1 + d2], channel) -- produced directly by the fused
    # host-built weight [Wd1 ; Wd1 + Wd2] / bias [bd1 ; bd1 + bd2]; no slices,
    # adds, or concat inside the kernel.
    comb = (jnp.dot(wd_ref[...], o1.astype(compute_dtype),
                    preferred_element_type=jnp.float32) + bd_ref[...])

    # 0.2 * c2(act(combine))  (the 0.2 is folded into w2/b2 on the host)
    h = _leaky_relu(comb).astype(compute_dtype)
    o2 = jnp.dot(w2_ref[...], h, preferred_element_type=jnp.float32) + b2_ref[...]

    # output = input + 0.2 * output2
    o_ref[...] = (x.astype(jnp.float32) + o2).astype(o_ref.dtype)


def _vmem_cap_bytes():
    # 75% of physical VMEM when queryable (v7x: ~48 MiB, v5e/v6e: ~96 MiB);
    # otherwise a value that is safe on every TPU generation.
    try:
        return (int(pltpu.get_tpu_info().vmem_capacity_bytes) * 3) // 4
    except Exception:
        return 48 << 20


def _pick_tile(hw_padded, n_batch, max_tile, vmem_budget, c_padded):
    """Largest 128-multiple divisor of hw_padded fitting the VMEM budget; keeps
    >= 2 parallel grid steps when possible (v7x has 2 TensorCores/chip)."""
    # ~10 live / double-buffered (C, tile) f32-equivalent slabs post-fold.
    budget_tile = max(128, (vmem_budget // (10 * c_padded * 4)) // 128 * 128)
    cap = min(max_tile, budget_tile, hw_padded)
    divisors = [t for t in range(128, hw_padded + 1, 128) if hw_padded % t == 0]
    fitting = [t for t in divisors if t <= cap] or [divisors[0]]
    tile = max(fitting)
    if n_batch * (hw_padded // tile) < 2:           # megacore balance (v7x)
        halves = [t for t in fitting if hw_padded // t >= 2]
        if halves:
            tile = max(halves)
    return tile


def resblock_pallas(x_nchw, params, *, tile_hw=4096, compute_dtype=jnp.float32):
    """ResBlock forward.

    x_nchw : (N, C, H, W), PyTorch NCHW layout. f32 or bf16 (the kernel is
             HBM-bandwidth-bound, so bf16 activations roughly halve wall-clock).
    params : dict with weights in (Cin, Cout) layout, biases (1, Cout).
             (Real PyTorch Conv2d weights are (Cout, Cin, 1, 1): reshape to
              (Cout, Cin) and transpose before passing here.)
    compute_dtype : matmul-operand dtype. float32 on v5e (no bf16 VPU and the
             kernel is mem-bound there); bf16 recommended on v6e/v7x.
             Accumulation and element-wise math are always f32.
    """
    N, C, H, W = x_nchw.shape
    assert C % 2 == 0, "ResBlock requires an even channel count (nc // 2 split)"
    half = C // 2
    HW = H * W

    # Native layout: (N, C, H*W) -- a free reshape, no wrapper transposes.
    x3d = x_nchw.reshape(N, C, HW)

    # Minimal padding only if H*W is not a multiple of 128 (rare for images);
    # the tile is then chosen as a divisor of the (padded) pixel count, so no
    # full-tensor pad/slice HBM passes are needed in the common case.
    HWp = _round_up(HW, 128)
    if HWp != HW:
        x3d = jnp.pad(x3d, ((0, 0), (0, 0), (0, HWp - HW)))

    cpad = _round_up(C, 8)
    vmem_cap = _vmem_cap_bytes()
    max_tile = max(128, (int(tile_hw) // 128) * 128)
    tile = _pick_tile(HWp, N, max_tile, vmem_cap, cpad)

    # Host-side weight prep:
    #   * transpose to (Cout, Cin) so the kernel computes W @ x_tile,
    #   * fold the d1+d2 add and the channel concat into one fused (C, C)
    #     weight [Wd1 ; Wd1 + Wd2] (bias [bd1 ; bd1 + bd2]),
    #   * fold the 0.2 residual scale into c2's weights/bias.
    cd = compute_dtype
    w1t = params["w1"].T.astype(cd)                                    # (C, C)
    b1c = params["b1"].reshape(C, 1).astype(jnp.float32)               # (C, 1)
    wd1t = params["wd1"].T                                             # (half, C)
    wd2t = params["wd2"].T                                             # (half, C)
    wdt = jnp.concatenate([wd1t, wd1t + wd2t], axis=0).astype(cd)      # (C, C)
    bd1 = params["bd1"].reshape(half)
    bd2 = params["bd2"].reshape(half)
    bdc = jnp.concatenate([bd1, bd1 + bd2], axis=0).reshape(C, 1).astype(jnp.float32)
    w2t = (0.2 * params["w2"].T).astype(cd)                            # (C, C)
    b2c = (0.2 * params["b2"]).reshape(C, 1).astype(jnp.float32)

    grid = (N, HWp // tile)

    # Constant weight/bias blocks: same block every grid step (no re-DMA).
    const = lambda shape: pl.BlockSpec(shape, lambda n, p: (0, 0))

    # Scoped-VMEM budget: double-buffered in/out tiles + f32 intermediates
    # + resident weights, clamped to <= 75% of physical VMEM (v7x-safe).
    itemsize = jnp.dtype(x3d.dtype).itemsize
    est = (4 * cpad * tile * itemsize            # 2x in + 2x out tiles
           + 6 * cpad * tile * 4                 # in-kernel intermediates (f32)
           + 4 * cpad * cpad * 4 + (1 << 20))    # weights/biases + slack
    vmem_limit = int(min(max(est, 32 << 20), vmem_cap))

    kernel = functools.partial(resblock_kernel, compute_dtype=cd)

    out3d = pl.pallas_call(
        kernel,
        out_shape=jax.ShapeDtypeStruct((N, C, HWp), x3d.dtype),
        grid_spec=pltpu.PrefetchScalarGridSpec(
            num_scalar_prefetch=0,
            grid=grid,
            in_specs=[
                pl.BlockSpec((None, C, tile), lambda n, p: (n, 0, p)),   # x tile
                const((C, C)), const((C, 1)),                            # c1
                const((C, C)), const((C, 1)),                            # fused d1|d2 -> combine
                const((C, C)), const((C, 1)),                            # c2 (0.2 folded)
            ],
            out_specs=pl.BlockSpec((None, C, tile), lambda n, p: (n, 0, p)),
        ),
        compiler_params=pltpu.CompilerParams(
            dimension_semantics=("parallel", "parallel"),
            vmem_limit_bytes=vmem_limit),
    )(x3d, w1t, b1c, wdt, bdc, w2t, b2c)

    if HWp != HW:
        out3d = out3d[:, :, :HW]
    return out3d.reshape(N, C, H, W)


def make_params(nc, key):
    """Deterministic synthetic parameters. Weight layout: (Cin, Cout)."""
    ks = jax.random.split(key, 8)
    half = nc // 2
    scale = 1.0 / jnp.sqrt(nc)
    return {
        "w1":  scale * jax.random.normal(ks[0], (nc, nc), jnp.float32),
        "b1":  0.1 * jax.random.normal(ks[1], (1, nc), jnp.float32),
        "wd1": scale * jax.random.normal(ks[2], (nc, half), jnp.float32),
        "bd1": 0.1 * jax.random.normal(ks[3], (1, half), jnp.float32),
        "wd2": scale * jax.random.normal(ks[4], (nc, half), jnp.float32),
        "bd2": 0.1 * jax.random.normal(ks[5], (1, half), jnp.float32),
        "w2":  scale * jax.random.normal(ks[6], (nc, nc), jnp.float32),
        "b2":  0.1 * jax.random.normal(ks[7], (1, nc), jnp.float32),
    }


def resblock_ref(x, params):
    """Pure-JAX reference matching the PyTorch module (NCHW, 1x1 convs)."""
    def conv1x1(v, w, b):        # v: (N,Cin,H,W); w: (Cin,Cout); b: (1,Cout)
        return jnp.einsum("nchw,cd->ndhw", v, w) + b.reshape(1, -1, 1, 1)
    lrelu = lambda v: jnp.where(v >= 0, v, 0.2 * v)
    o1 = lrelu(conv1x1(x, params["w1"], params["b1"]))
    d1 = conv1x1(o1, params["wd1"], params["bd1"])
    d2 = conv1x1(o1, params["wd2"], params["bd2"])
    add1 = d1 + d2
    combine = jnp.concatenate([d1, add1], axis=1)
    o2 = conv1x1(lrelu(combine), params["w2"], params["b2"])
    return x + 0.2 * o2


if __name__ == "__main__":
    nc = 4
    N, H, W = 2, 16, 16
    key = jax.random.PRNGKey(0)
    kx, kp = jax.random.split(key)
    x = jax.random.normal(kx, (N, nc, H, W), jnp.float32)
    params = make_params(nc, kp)

    ref = resblock_ref(x, params)

    # f32 compute path (matches the f32 reference up to fold-induced rounding).
    out = jax.block_until_ready(resblock_pallas(x, params))
    assert out.shape == (N, nc, H, W)
    assert jnp.allclose(out, ref, atol=1e-4, rtol=1e-4), "f32 mismatch vs reference"

    # bf16 matmul-operand path (recommended on v6e/v7x): looser tolerance.
    out_bf16 = jax.block_until_ready(
        resblock_pallas(x, params, compute_dtype=jnp.bfloat16))
    assert jnp.allclose(out_bf16, ref, atol=5e-2, rtol=5e-2), "bf16 compute mismatch"

    # bf16 activation-I/O path (halves HBM traffic on this mem-bound kernel).
    out_bf16_io = jax.block_until_ready(
        resblock_pallas(x.astype(jnp.bfloat16), params, compute_dtype=jnp.bfloat16))
    assert out_bf16_io.dtype == jnp.bfloat16
    assert jnp.allclose(out_bf16_io.astype(jnp.float32), ref, atol=1e-1, rtol=1e-1), \
        "bf16 I/O mismatch vs reference"

    print("KERNEL_OK")
</pallas_src>

<mosaic_0001>
module attributes {stable_mosaic.version = 11 : i64} {
  func.func @resblock_kernel(%arg0: i32, %arg1: i32, %arg2: memref<1x4x256xf32, #tpu.memory_space<vmem>>, %arg3: memref<4x4xf32, #tpu.memory_space<vmem>>, %arg4: memref<4x1xf32, #tpu.memory_space<vmem>>, %arg5: memref<4x4xf32, #tpu.memory_space<vmem>>, %arg6: memref<4x1xf32, #tpu.memory_space<vmem>>, %arg7: memref<4x4xf32, #tpu.memory_space<vmem>>, %arg8: memref<4x1xf32, #tpu.memory_space<vmem>>, %arg9: memref<1x4x256xf32, #tpu.memory_space<vmem>>) attributes {dimension_semantics = [#tpu.dimension_semantics<parallel>, #tpu.dimension_semantics<parallel>], iteration_bounds = array<i64: 2, 1>, scalar_prefetch = 0 : i64, scratch_operands = 0 : i64, tpu.core_type = #tpu.core_type<tc>, window_params = [{transform_indices = @transform_0, window_bounds = array<i64: 1, 4, 256>}, {pipeline_mode = #tpu.pipeline_mode<synchronous>, transform_indices = @transform_1, window_bounds = array<i64: 4, 4>}, {pipeline_mode = #tpu.pipeline_mode<synchronous>, transform_indices = @transform_2, window_bounds = array<i64: 4, 1>}, {pipeline_mode = #tpu.pipeline_mode<synchronous>, transform_indices = @transform_3, window_bounds = array<i64: 4, 4>}, {pipeline_mode = #tpu.pipeline_mode<synchronous>, transform_indices = @transform_4, window_bounds = array<i64: 4, 1>}, {pipeline_mode = #tpu.pipeline_mode<synchronous>, transform_indices = @transform_5, window_bounds = array<i64: 4, 4>}, {pipeline_mode = #tpu.pipeline_mode<synchronous>, transform_indices = @transform_6, window_bounds = array<i64: 4, 1>}, {transform_indices = @transform_7, window_bounds = array<i64: 1, 4, 256>}]} {
    %c0 = arith.constant 0 : index
    %c0_0 = arith.constant 0 : index
    %c0_1 = arith.constant 0 : index
    %0 = vector.load %arg2[%c0, %c0_0, %c0_1] : memref<1x4x256xf32, #tpu.memory_space<vmem>>, vector<1x4x256xf32>
    %1 = vector.shape_cast %0 : vector<1x4x256xf32> to vector<4x256xf32>
    %c0_2 = arith.constant 0 : index
    %c0_3 = arith.constant 0 : index
    %2 = vector.load %arg3[%c0_2, %c0_3] : memref<4x4xf32, #tpu.memory_space<vmem>>, vector<4x4xf32>
    %cst = arith.constant dense<0.000000e+00> : vector<4x256xf32>
    %3 = tpu.matmul %2, %1, %cst {dimension_numbers = #tpu.dot_dimension_numbers<[1], [0], [0], [1], [0, 0, 1, 1], [], []>} : vector<4x4xf32>, vector<4x256xf32>, vector<4x256xf32> -> vector<4x256xf32>
    %c0_4 = arith.constant 0 : index
    %c0_5 = arith.constant 0 : index
    %4 = vector.load %arg4[%c0_4, %c0_5] : memref<4x1xf32, #tpu.memory_space<vmem>>, vector<4x1xf32>
    %5 = vector.broadcast %4 : vector<4x1xf32> to vector<4x256xf32>
    %6 = arith.addf %3, %5 : vector<4x256xf32>
    %cst_6 = arith.constant 2.000000e-01 : f32
    %7 = vector.broadcast %cst_6 : f32 to vector<4x256xf32>
    %8 = arith.mulf %7, %6 : vector<4x256xf32>
    %9 = arith.maximumf %6, %8 : vector<4x256xf32>
    %c0_7 = arith.constant 0 : index
    %c0_8 = arith.constant 0 : index
    %10 = vector.load %arg5[%c0_7, %c0_8] : memref<4x4xf32, #tpu.memory_space<vmem>>, vector<4x4xf32>
    %cst_9 = arith.constant dense<0.000000e+00> : vector<4x256xf32>
    %11 = tpu.matmul %10, %9, %cst_9 {dimension_numbers = #tpu.dot_dimension_numbers<[1], [0], [0], [1], [0, 0, 1, 1], [], []>} : vector<4x4xf32>, vector<4x256xf32>, vector<4x256xf32> -> vector<4x256xf32>
    %c0_10 = arith.constant 0 : index
    %c0_11 = arith.constant 0 : index
    %12 = vector.load %arg6[%c0_10, %c0_11] : memref<4x1xf32, #tpu.memory_space<vmem>>, vector<4x1xf32>
    %13 = vector.broadcast %12 : vector<4x1xf32> to vector<4x256xf32>
    %14 = arith.addf %11, %13 : vector<4x256xf32>
    %cst_12 = arith.constant 2.000000e-01 : f32
    %15 = vector.broadcast %cst_12 : f32 to vector<4x256xf32>
    %16 = arith.mulf %15, %14 : vector<4x256xf32>
    %17 = arith.maximumf %14, %16 : vector<4x256xf32>
    %c0_13 = arith.constant 0 : index
    %c0_14 = arith.constant 0 : index
    %18 = vector.load %arg7[%c0_13, %c0_14] : memref<4x4xf32, #tpu.memory_space<vmem>>, vector<4x4xf32>
    %cst_15 = arith.constant dense<0.000000e+00> : vector<4x256xf32>
    %19 = tpu.matmul %18, %17, %cst_15 {dimension_numbers = #tpu.dot_dimension_numbers<[1], [0], [0], [1], [0, 0, 1, 1], [], []>} : vector<4x4xf32>, vector<4x256xf32>, vector<4x256xf32> -> vector<4x256xf32>
    %c0_16 = arith.constant 0 : index
    %c0_17 = arith.constant 0 : index
    %20 = vector.load %arg8[%c0_16, %c0_17] : memref<4x1xf32, #tpu.memory_space<vmem>>, vector<4x1xf32>
    %21 = vector.broadcast %20 : vector<4x1xf32> to vector<4x256xf32>
    %22 = arith.addf %19, %21 : vector<4x256xf32>
    %23 = arith.addf %1, %22 : vector<4x256xf32>
    %c0_18 = arith.constant 0 : index
    %c0_19 = arith.constant 0 : index
    %c0_20 = arith.constant 0 : index
    %24 = vector.load %arg9[%c0_18, %c0_19, %c0_20] : memref<1x4x256xf32, #tpu.memory_space<vmem>>, vector<1x4x256xf32>
    %25 = vector.shape_cast %24 : vector<1x4x256xf32> to vector<4x256xf32>
    %26 = vector.shape_cast %23 : vector<4x256xf32> to vector<1x4x256xf32>
    tpu.vector_store %arg9[%c0_18, %c0_19, %c0_20], %26 {strides = array<i32>} : memref<1x4x256xf32, #tpu.memory_space<vmem>>, vector<1x4x256xf32>,
    return
  }
  func.func @transform_0(%arg0: i32, %arg1: i32) -> (i32, i32, i32) {
    %c0_i32 = arith.constant 0 : i32
    %c0_i32_0 = arith.constant 0 : i32
    return %arg0, %c0_i32, %arg1 : i32, i32, i32
  }
  func.func @transform_1(%arg0: i32, %arg1: i32) -> (i32, i32) {
    %c0_i32 = arith.constant 0 : i32
    %c0_i32_0 = arith.constant 0 : i32
    %c0_i32_1 = arith.constant 0 : i32
    return %c0_i32, %c0_i32_0 : i32, i32
  }
  func.func @transform_2(%arg0: i32, %arg1: i32) -> (i32, i32) {
    %c0_i32 = arith.constant 0 : i32
    %c0_i32_0 = arith.constant 0 : i32
    %c0_i32_1 = arith.constant 0 : i32
    return %c0_i32, %c0_i32_0 : i32, i32
  }
  func.func @transform_3(%arg0: i32, %arg1: i32) -> (i32, i32) {
    %c0_i32 = arith.constant 0 : i32
    %c0_i32_0 = arith.constant 0 : i32
    %c0_i32_1 = arith.constant 0 : i32
    return %c0_i32, %c0_i32_0 : i32, i32
  }
  func.func @transform_4(%arg0: i32, %arg1: i32) -> (i32, i32) {
    %c0_i32 = arith.constant 0 : i32
    %c0_i32_0 = arith.constant 0 : i32
    %c0_i32_1 = arith.constant 0 : i32
    return %c0_i32, %c0_i32_0 : i32, i32
  }
  func.func @transform_5(%arg0: i32, %arg1: i32) -> (i32, i32) {
    %c0_i32 = arith.constant 0 : i32
    %c0_i32_0 = arith.constant 0 : i32
    %c0_i32_1 = arith.constant 0 : i32
    return %c0_i32, %c0_i32_0 : i32, i32
  }
  func.func @transform_6(%arg0: i32, %arg1: i32) -> (i32, i32) {
    %c0_i32 = arith.constant 0 : i32
    %c0_i32_0 = arith.constant 0 : i32
    %c0_i32_1 = arith.constant 0 : i32
    return %c0_i32, %c0_i32_0 : i32, i32
  }
  func.func @transform_7(%arg0: i32, %arg1: i32) -> (i32, i32, i32) {
    %c0_i32 = arith.constant 0 : i32
    %c0_i32_0 = arith.constant 0 : i32
    return %arg0, %c0_i32, %arg1 : i32, i32, i32
  }
}

</mosaic_0001>

<bundles_post_ra>
// kernel: tpu_custom_call.1
= control target key start
LH: loop header
LB: loop body
LE: loop exit
PB: predicated region body
PF: predicated region fallthrough
CT: control target
= control target key end

     0   :  { %12 = vsyncpa [#allocation3], 0  ;;  %s1148_s0 = inlined_call_operand.hbm [shape: f32[2,4,256], index: 0, kind: input, shape index: {}]   ;;  %s1149_s1 = inlined_call_operand.vmem [shape: f32[4,4], index: 1, kind: input, shape index: {}]   ;;  %s1150_s2 = inlined_call_operand.vmem [shape: f32[4,1], index: 2, kind: input, shape index: {}]   ;;  %s1151_s3 = inlined_call_operand.vmem [shape: f32[4,4], index: 3, kind: input, shape index: {}]   ;;  %s1152_s4 = inlined_call_operand.vmem [shape: f32[4,1], index: 4, kind: input, shape index: {}]   ;;  %s1153_s5 = inlined_call_operand.vmem [shape: f32[4,4], index: 5, kind: input, shape index: {}]   ;;  %s1154_s6 = inlined_call_operand.vmem [shape: f32[4,1], index: 6, kind: input, shape index: {}]   ;;  %s1155_s7 = inlined_call_operand.hbm [shape: f32[2,4,256], index: 7, kind: output, shape index: {}]  }
   0x1   :  { %14 = vsyncpa [#allocation3 + $0x1], 0 }
   0x2   :  { %15 = vsyncpa [#allocation4], 0 }
   0x3   :  { %17 = vsyncpa [#allocation4 + $0x1], 0  ;;  %s945_s24 = smov 0   ;;  %s947_s25 = smov 0  }
   0x4   :  { %s949_s26 = smov 0   ;;  %s951_s27 = smov 0  }
   0x5   :  { %s953_s28 = smov 0   ;;  %s955_s29 = smov 0  }
   0x6 LB: > { %s694_s30 = sadd.s32 4294967295, %s899_s29   ;;  %s695_s8 = sadd.s32 4294967294, %s899_s29   ;;  %s899_s29 = sphi %s955_s29, %s23_s29   ;;  %s895_s28 = sphi %s953_s28, %s1171_s28   ;;  %s891_s27 = sphi %s951_s27, %s1170_s27   ;;  %s887_s26 = sphi %s949_s26, %s1169_s26   ;;  %s883_s25 = sphi %s947_s25, %s1168_s25   ;;  %s879_s24 = sphi %s945_s24, %s1167_s24  }
   0x7   : > { %s35_s9 = sadd.s32 1, %s895_s28  ;;  %s44_s10 = sadd.s32 1, %s887_s26 }
   0x8   : > { %p37_p0 = scmp.ge.s32.totalorder %s35_s9, 2  ;;  %p51_p1 = scmp.ne.s32.totalorder %s887_s26, %s883_s25 }
   0x9   : > { %p52_p2 = scmp.eq.s32.totalorder %s899_s29, 0  ;;  %p57_p3 = scmp.ne.s32.totalorder %s883_s25, %s879_s24 }
   0xa   : > { %s1173_s9 = smov (%p37_p0, %s35_s9), 0  ;;  %p58_p5 = scmp.eq.s32.totalorder %s694_s30, 0 }
   0xb   : > { %p986_p4 = por %p52_p2, %p51_p1  ;;  %s39_s12 = ssub.s32 %s895_s28, %s1173_s9 }
   0xc   : > { %p209_p6 = scmp.eq.s32.totalorder %s694_s30, 1  ;;  %p42_p7 = scmp.eq.s32.totalorder %s39_s12, 0 }
   0xd   : > { %p992_p8 = por %p58_p5, %p57_p3  ;;  %p215_p10 = scmp.eq.s32.totalorder %s695_s8, 1 }
   0xe   : > { %p996_p9 = por %p209_p6, %p51_p1  ;;  %p732_p13 = scmp.lt.s32.totalorder %s899_s29, 2 }
   0xf   : > { %s1001_s15 = scalar_select %p42_p7, %s887_s26, %s44_s10  }
  0x10   : > { %s1159_s14 = scalar_select %p996_p9, 1, 0 }
  0x11   : > { %p1003_p11 = por %p215_p10, %p57_p3  ;;  %s253_s17 = sand.u32 1, %s887_s26  }
  0x12   : > { %s698_s18 = sshll.u32 %s253_s17, 3  ;;  %s718_s19 = sshll.u32 %s895_s28, 7 }
  0x13   : > { %s1160_s16 = scalar_select %p1003_p11, 1, 0 }
  0x14   : > { %s1014_s22 = scalar_lea.hbm %s1148_s0, %s718_s19  ;;  %s257_s23 = scalar_lea.vmem [#allocation2], %s698_s18 }
  0x15   : > { %s267_s30 = sshll.u32 %s257_s23, 4  ;;  %p1020_p0 = pnand %p732_p13, %p986_p4  ;;  %s1016_s30 = int_to_ptr.vmem [resolvable:$true] %s267_s30 }
  0x16   : > { %s254_s10 = scalar_lea.sflag [#allocation3], %s253_s17  ;;  %s787_s12 = scalar_lea.hbm %s1014_s22, 128 }
  0x17   : > { %p788_p3 = scmp.ne.s32.totalorder %s1014_s22, %s787_s12  ;;  %p789_p5 = pneg %p1020_p0 }
  0x18   : > { %s792_s11 = scalar_lea.hbm %s1148_s0, 256  ;;  %p793_p4 = scmp.lt.u32.totalorder %s1014_s22, %s1148_s0 }
  0x19   : > { %p790_p6 = pnand %p789_p5, %p788_p3  ;;  %p794_p10 = scmp.lt.u32.totalorder %s792_s11, %s787_s12 }
  0x1a   : > { %p796_p12 = scmp.lt.u32.totalorder %s787_s12, %s1014_s22 }
  0x1b   : > { %p791_p7 = pneg %p790_p6  ;;  %p795_p13 = por %p794_p10, %p793_p4 }
  0x1d   : > { %p797_p1 = por %p796_p12, %p795_p13 }
  0x1f   : > { %p798_p2 = pnand %p797_p1, %p791_p7 }
  0x21   : > { %801 = shalt.err (!%p798_p2)
}
  0x22   : > { %s802_s17 = scalar_lea.vmem %s1016_s30, 128  ;;  %s901_s23 = smov [#allocation2]  }
  0x23   : > { %p803_p3 = scmp.ne.s32.totalorder %s1016_s30, %s802_s17  ;;  %s807_s18 = sshll.u32 %s901_s23, 4  ;;  %s808_s18 = int_to_ptr.vmem [resolvable:$false] %s807_s18 }
  0x24   : > { %s809_s19 = scalar_lea.vmem %s808_s18, 256  ;;  %p810_p9 = scmp.lt.s32.totalorder %s1016_s30, %s808_s18 }
  0x25   : > { %p805_p6 = pnand %p803_p3, %p789_p5  ;;  %p811_p4 = scmp.lt.s32.totalorder %s809_s19, %s802_s17 }
  0x27   : > { %p806_p11 = pneg %p805_p6  ;;  %p812_p10 = por %p811_p4, %p810_p9 }
  0x29   : > { %p813_p12 = pnand %p812_p10, %p806_p11 }
  0x2b   : > { %816 = shalt.err (!%p813_p12)
}
  0x2c   : > { %727 = dma.hbm_to_vmem [thread:$0]  (!%p1020_p0), %s1014_s22, 128, %s1016_s30, %s254_s10  }
  0x2d   : > { %p1162_p1 = scmp.lt.s32.totalorder %s899_s29, 3  ;;  %p1163_p2 = scmp.ge.s32.totalorder %s899_s29, 1 }
  0x2f   : > { %p273_p5 = pnand %p1163_p2, %p1162_p1 }
  0x30   : > { %s1056_s12 = sand.u32 (!%p273_p5), 1, %s883_s25  }
  0x31   : > { %276 = sbr.rel (%p273_p5) target bundleno = 737 (0x2e1), region = 48  ;;  %s702_s11 = sshll.u32 (!%p273_p5), %s1056_s12, 3 }
  0x32   : > { %s279_s20 = scalar_lea.sflag (!%p273_p5), [#allocation3], %s1056_s12  ;;  %s282_s8 = scalar_lea.vmem (!%p273_p5), [#allocation2], %s702_s11 }
  0x38   : > { %870 = dma.done.wait (%p992_p8), %s279_s20, 128  }
  0x39   : > { %872 = vsyncadd (%p992_p8), %s279_s20, 4294967168  ;;  %v902_v0 = vmov 0.0   ;;  %v903_v1 = vmov 0   ;;  %v315_v2 = vld [vmem:[%s282_s8] sm:$0xff]  ;;  %vm329_vm0 = vcmask 1043456   ;;  %vm325_vm1 = vcmask 31744  }
  0x3a   : > { %398 = vmatprep.mubr.f32.mxu0 %v902_v0  ;;  %784 = vset.pattern.permute.xlu0 %v903_v1  ;;  %v317_v3 = vld [vmem:[%s1150_s2] sm:$0xf]  ;;  %v324_v4 = vcombine.high %v315_v2, %v315_v2  ;;  %s719_s30 = sshll.u32 %s891_s27, 7  ;;  %s312_s10 = scalar_lea.vmem [#allocation5], %s702_s11 }
  0x3b   : > { %489 = vmatprep.mubr.f32.mxu1 %v902_v0  ;;  %785 = vset.pattern.permute.xlu1 %v903_v1  ;;  %v316_v5 = vld [vmem:[%s1149_s1] sm:$0xf]  ;;  %s610_s21 = sshll.u32 %s312_s10, 4  ;;  %s1099_s23 = scalar_lea.hbm %s1155_s7, %s719_s30  ;;  %s1101_s21 = int_to_ptr.vmem [resolvable:$true] %s610_s21 }
  0x3c   : > { %320 = vperm.xlu0 %784, %v317_v3   ;;  %v410_v6 = vld [vmem:[%s1152_s4] sm:$0xf]  ;;  %704 = vmatprep.subr.msk.mxu0 %vm329_vm0, %v324_v4  ;;  %s594_s18 = scalar_lea.sflag [#allocation4], %s1056_s12  ;;  %s817_s19 = scalar_lea.vmem %s1101_s21, 128 }
  0x3d   : > { %705 = vmatpush1.msk.msra.mxu0 %vm329_vm0, %v315_v2  ;;  %v409_v16 = vld [vmem:[%s1151_s3] sm:$0xf]  ;;  %p818_p8 = scmp.ne.s32.totalorder %s1101_s21, %s817_s19  ;;  %p1164_p9 = scmp.ne.s32.totalorder %s1159_s14, 0 }
  0x3e   : > { %706 = vmatmul.mubr.msk.f32.vlgmr.msra.gmra.mrb[0].mxu0 %vm325_vm1, %v316_v5  ;;  %v501_v17 = vld [vmem:[%s1154_s6] sm:$0xf]  ;;  %s904_s27 = smov [#allocation5]  }
  0x3f   : > { %580 = vmatprep.mubr.f32.mxu0 %v902_v0  ;;  %504 = vperm.xlu1 %785, %v501_v17   ;;  %v500_v27 = vld [vmem:[%s1153_s5] sm:$0xf]  ;;  %p819_p11 = pnand %p818_p8, %p1164_p9  ;;  %s821_s11 = sshll.u32 %s904_s27, 4  ;;  %s822_s11 = int_to_ptr.vmem [resolvable:$false] %s821_s11 }
  0x40   : > { %413 = vperm.xlu0 %784, %v410_v6   ;;  %s823_s20 = scalar_lea.vmem %s822_s11, 256  ;;  %p824_p7 = scmp.lt.s32.totalorder %s1101_s21, %s822_s11 }
  0x41   : > { %p820_p0 = pneg %p819_p11  ;;  %p825_p13 = scmp.lt.s32.totalorder %s823_s20, %s817_s19 }
  0x43   : > { %p826_p3 = por %p825_p13, %p824_p7 }
  0x45   : > { %p827_p6 = pnand %p826_p3, %p820_p0 }
  0xbb   : > { %v321_v7 = vpop.permute.xlu0 %320 }
  0xbe   : > { %v505_v28 = vpop.permute.xlu1 %504 }
  0xbf   : > { %v414_v18 = vpop.permute.xlu0 %413 }
 0x111   : > { %v400_v8 = vpop.f32.mrb[0].mxu0 }
 0x112   : > { %v401_v9 = vadd.f32 %v400_v8, %v321_v7  ;;  %v402_v10 = vpop.f32.mrb[1].mxu0 }
 0x113   : > { %v403_v11 = vadd.f32 %v402_v10, %v321_v7 }
 0x114   : > { %v405_v12 = vmul.f32 0.2, %v401_v9 }
 0x115   : > { %v406_v13 = vmul.f32 0.2, %v403_v11 }
 0x116   : > { %v407_v15 = vmax.f32 %v401_v9, %v405_v12 }
 0x117   : > { %v408_v14 = vmax.f32 %v403_v11, %v406_v13 }
 0x119   : > { %707 = vmatprep.subr.msk.mxu1 %vm329_vm0, %v408_v14 }
 0x11a   : > { %708 = vmatpush1.msk.msra.mxu1 %vm329_vm0, %v407_v15 }
 0x11b   : > { %709 = vmatmul.mubr.msk.f32.vlgmr.msra.gmra.mrb[0].mxu1 %vm325_vm1, %v409_v16 }
 0x1ee   : > { %v491_v19 = vpop.f32.mrb[0].mxu1 }
 0x1ef   : > { %v492_v20 = vadd.f32 %v491_v19, %v414_v18  ;;  %v493_v21 = vpop.f32.mrb[1].mxu1 }
 0x1f0   : > { %v494_v22 = vadd.f32 %v493_v21, %v414_v18 }
 0x1f1   : > { %v496_v23 = vmul.f32 0.2, %v492_v20 }
 0x1f2   : > { %v497_v24 = vmul.f32 0.2, %v494_v22 }
 0x1f3   : > { %v498_v26 = vmax.f32 %v492_v20, %v496_v23 }
 0x1f4   : > { %v499_v25 = vmax.f32 %v494_v22, %v497_v24 }
 0x1f6   : > { %710 = vmatprep.subr.msk.mxu0 %vm329_vm0, %v499_v25 }
 0x1f7   : > { %711 = vmatpush1.msk.msra.mxu0 %vm329_vm0, %v498_v26 }
 0x1f8   : > { %712 = vmatmul.mubr.msk.f32.vlgmr.msra.gmra.mrb[2].mxu0 %vm325_vm1, %v500_v27 }
 0x2cb   : > { %v582_v29 = vpop.f32.mrb[2].mxu0 }
 0x2cc   : > { %v583_v30 = vadd.f32 %v582_v29, %v505_v28  ;;  %v584_v31 = vpop.f32.mrb[3].mxu0 }
 0x2cd   : > { %v585_v32 = vadd.f32 %v584_v31, %v505_v28 }
 0x2cf   : > { %v589_v33 = vcombine.low %v583_v30, %v585_v32 }
 0x2d1   : > { %v591_v34 = vadd.f32 %v589_v33, %v315_v2 }
 0x2d3   : > { %592 = vst [vmem:[%s312_s10] sm:$0xff] %v591_v34 }
 0x2d4   : > { %830 = shalt.err (!%p827_p6)
}
 0x2d5   : > { %s831_s12 = scalar_lea.hbm %s1099_s23, 128  ;;  %s835_s30 = scalar_lea.hbm %s1155_s7, 256 }
 0x2d6   : > { %p832_p4 = scmp.ne.s32.totalorder %s1099_s23, %s831_s12  ;;  %p836_p1 = scmp.lt.u32.totalorder %s1099_s23, %s1155_s7 }
 0x2d7   : > { %p837_p2 = scmp.lt.u32.totalorder %s835_s30, %s831_s12  ;;  %p839_p8 = scmp.lt.u32.totalorder %s831_s12, %s1099_s23 }
 0x2d8   : > { %p833_p10 = pnand %p832_p4, %p1164_p9 }
 0x2d9   : > { %p838_p5 = por %p837_p2, %p836_p1 }
 0x2da   : > { %p834_p12 = pneg %p833_p10 }
 0x2db   : > { %p840_p11 = por %p839_p8, %p838_p5 }
 0x2dd   : > { %p841_p0 = pnand %p840_p11, %p834_p12 }
 0x2df   : > { %844 = shalt.err (!%p841_p0)
}
 0x2e0   : > { %722 = dma.vmem_to_hbm [thread:$0]  (%p1164_p9), %s1101_s21, 128, %s1099_s23, %s594_s18  }
 0x2e1 PF: > { %s622_s17 = sand.u32 1, %s879_s24   ;;  %p1165_p7 = scmp.ne.s32.totalorder %s1160_s16, 0 }
 0x2e2   : > { %p1166_p13 = scmp.ge.s32.totalorder %s899_s29, 2  ;;  %s623_s19 = scalar_lea.sflag [#allocation4], %s622_s17 }
 0x2e4   : > { %p729_p3 = pnand %p1166_p13, %p1165_p7 }
 0x2e6   : > { %874 = dma.done.wait (!%p729_p3), %s623_s19, 128  }
 0x2e7   : > { %876 = vsyncadd (!%p729_p3), %s623_s19, 4294967168  ;;  %s23_s29 = sadd.s32 1, %s899_s29   ;;  %s1167_s24 = smov %s883_s25 }
 0x2e8   : > { %p20_p6 = scmp.ge.s32.totalorder %s23_s29, 4   ;;  %s1168_s25 = smov %s887_s26 }
 0x2e9   : > { %s1169_s26 = smov %s1001_s15  ;;  %s1170_s27 = smov %s895_s28 }
 0x2ea   : > { %s1171_s28 = smov %s1173_s9  ;;  %22 = sbr.rel (!%p20_p6) target bundleno = 6 (0x6), region = 93 }
 0x2f1   :  { %628 = vsyncpa [#allocation3], 1 }
 0x2f2   :  { %630 = vsyncpa [#allocation3 + $0x1], 1 }
 0x2f3   :  { %631 = vsyncpa [#allocation4], 1 }
 0x2f4   :  { %633 = vsyncpa [#allocation4 + $0x1], 1 }

</bundles_post_ra>
